<compile_context>
chip_gen: v5e
topology: v5e:2x2
jax: 0.10.0
libtpu: 0.0.40
codegen_flags: <defaults>
</compile_context>

<pallas_src>
import functools

import jax
import jax.numpy as jnp
from jax import lax
from jax.experimental import pallas as pl
from jax.experimental.pallas import tpu as pltpu


def _vmem_capacity_bytes():
    """Physical VMEM of the local chip; conservative fallback if unqueryable."""
    try:
        cap = getattr(pltpu.get_tpu_info(), "vmem_capacity_bytes", None)
        if cap:
            return int(cap)
    except Exception:
        pass
    return 64 << 20  # v7x per-TC (smallest of the supported generations)


def _choose_hw_tile(hw, c_blk, itembytes, budget_bytes):
    """HW tile: full-dim block if it fits, else largest 128-multiple in budget.

    No divisor constraint — a ragged last tile is handled by in-kernel masking.
    """
    if c_blk * hw * itembytes <= budget_bytes:
        return hw                         # full-dim block (any alignment is legal)
    per_lane = itembytes * max(c_blk, 1)
    lanes = (budget_bytes // (per_lane * 128)) * 128
    lanes = max(lanes, 128)
    return min(lanes, pl.cdiv(hw, 128) * 128)


def _gap_reduce_kernel(x_ref, w_ref, o_ref, acc_ref, *,
                       inv_hw, hw, hw_tile, num_hw_tiles, ragged):
    # x_ref:   (c_blk, hw_tile)  HW tile of one batch element / channel chunk
    # w_ref:   (c_out, c_blk)    1x1-conv weight chunk with BN scale folded in
    # o_ref:   (c_out, 1)        partial (pre-bias / pre-ReLU) conv output
    # acc_ref: (c_blk, 1)        running spatial sum (f32 VMEM scratch)
    j = pl.program_id(2)
    last = num_hw_tiles - 1

    @pl.when(j == 0)
    def _():
        acc_ref[...] = jnp.zeros_like(acc_ref)

    if ragged:
        @pl.when(j != last)
        def _():
            acc_ref[...] += jnp.sum(x_ref[...].astype(jnp.float32),
                                    axis=-1, keepdims=True)

        @pl.when(j == last)
        def _():
            # The last block extends past HW; out-of-bounds columns of the VMEM
            # block are undefined, so mask them explicitly (rem is static).
            rem = hw - last * hw_tile            # 0 < rem <= hw_tile
            x = x_ref[...].astype(jnp.float32)
            col = lax.broadcasted_iota(jnp.int32, x.shape, 1)
            x = jnp.where(col < rem, x, 0.0)
            acc_ref[...] += jnp.sum(x, axis=-1, keepdims=True)
    else:
        acc_ref[...] += jnp.sum(x_ref[...].astype(jnp.float32),
                                axis=-1, keepdims=True)

    @pl.when(j == last)
    def _():
        mean = acc_ref[...] * inv_hw                                   # (c_blk, 1)
        # Tiny matvec, never on the critical path; HIGHEST keeps f32 parity.
        o_ref[...] = jnp.dot(w_ref[...], mean,
                             precision=lax.Precision.HIGHEST,
                             preferred_element_type=jnp.float32)       # (c_out, 1)


def global_avg_pooling(x, conv_w, bn_gamma, bn_beta, bn_mean, bn_var,
                       eps=1e-5, hw_tile=None):
    """x: (N, Cin, H, W) NCHW.  conv_w: (Cout, Cin, 1, 1).  Returns (N, Cout, H, W)."""
    n, c_in, h, w = x.shape
    c_out = conv_w.shape[0]
    hw = h * w

    x2 = x.reshape(n, c_in, hw)
    itembytes = x2.dtype.itemsize

    # v7x lever: when N cannot feed both TensorCores, split Cin across a leading
    # parallel grid axis (requires c_in/2 to stay sublane-aligned).  Neutral on
    # single-TC chips: the HW tile grows so per-step DMA bytes are unchanged.
    c_split = 2 if (n == 1 and c_in % 16 == 0) else 1
    c_blk = c_in // c_split

    # Per-chip, per-buffer input-tile budget (the pipeline double-buffers it).
    vmem_cap = _vmem_capacity_bytes()
    tile_budget = (14 << 20) if vmem_cap <= (80 << 20) else (8 << 20)
    w_resident = 2 * c_out * c_in * 4        # folded f32 weight, 2 buffers (conservative)
    tile_budget = max(1 << 20, tile_budget - w_resident)

    if hw_tile is None:
        hw_tile = _choose_hw_tile(hw, c_blk, itembytes, tile_budget)
    assert hw_tile == hw or hw_tile % 128 == 0, \
        "hw_tile must equal H*W or be a multiple of 128"
    num_hw_tiles = int(pl.cdiv(hw, hw_tile))
    ragged = (hw % hw_tile) != 0

    # Fold eval-mode BN into the conv weight; bias (+ ReLU) is applied after the
    # channel-split partials are combined in the wrapper.
    scale = bn_gamma / jnp.sqrt(bn_var + eps)                          # (Cout,)
    w_eff = (conv_w.reshape(c_out, c_in) * scale[:, None]).astype(jnp.float32)
    bias = (bn_beta - bn_mean * scale).astype(jnp.float32)             # (Cout,)
    # Lay the channel chunk out as the leading dim so the weight block equals
    # the full trailing dims (no (8,128) constraint on c_blk).
    w3 = w_eff.reshape(c_out, c_split, c_blk).transpose(1, 0, 2)       # (c_split, Cout, c_blk)

    # Explicit scoped-VMEM limit sized from the actual tiles (+ slack), clamped
    # below physical capacity.  Keeps v5e's 16 MiB default from biting and
    # leaves headroom on v7x's 64 MiB.
    tile_bytes = c_blk * hw_tile * itembytes
    vmem_limit = 2 * tile_bytes + w_resident + (4 << 20)
    vmem_limit = int(min(max(vmem_limit, 16 << 20), vmem_cap - (4 << 20)))

    kernel = functools.partial(
        _gap_reduce_kernel, inv_hw=1.0 / hw, hw=hw, hw_tile=hw_tile,
        num_hw_tiles=num_hw_tiles, ragged=ragged)

    partials = pl.pallas_call(
        kernel,
        out_shape=jax.ShapeDtypeStruct((c_split * n, c_out, 1), jnp.float32),
        grid_spec=pltpu.PrefetchScalarGridSpec(
            num_scalar_prefetch=0,
            grid=(c_split, n, num_hw_tiles),            # reduction axis last
            in_specs=[
                pl.BlockSpec((None, c_blk, hw_tile), lambda c, i, j: (i, c, j)),
                pl.BlockSpec((None, c_out, c_blk), lambda c, i, j: (c, 0, 0)),
            ],
            out_specs=pl.BlockSpec((None, c_out, 1),
                                   lambda c, i, j: (c * n + i, 0, 0)),
            scratch_shapes=[pltpu.VMEM((c_blk, 1), jnp.float32)],
        ),
        compiler_params=pltpu.CompilerParams(
            dimension_semantics=("parallel", "parallel", "arbitrary"),
            vmem_limit_bytes=vmem_limit),
    )(x2, w3)

    # Combine channel-split partials, add the fused BN bias, ReLU — tiny
    # (N, Cout) work that XLA fuses with the broadcast below.
    y = partials.reshape(c_split, n, c_out).sum(axis=0) + bias[None, :]
    y = jnp.maximum(y, 0.0)

    # Bilinear upsample from a 1x1 source with align_corners=True is a pure
    # broadcast; defer it to XLA so it fuses into the consumer instead of the
    # kernel writing N*Cout*H*W bytes of replication.
    return jnp.broadcast_to(y[:, :, None, None].astype(x.dtype), (n, c_out, h, w))


def reference(x, conv_w, bn_gamma, bn_beta, bn_mean, bn_var, eps=1e-5):
    n, c_in, h, w = x.shape
    c_out = conv_w.shape[0]
    pool = jnp.mean(x, axis=(2, 3))                              # (N, Cin)
    y = pool @ conv_w.reshape(c_out, c_in).T                     # (N, Cout)
    y = (y - bn_mean) / jnp.sqrt(bn_var + eps) * bn_gamma + bn_beta
    y = jnp.maximum(y, 0.0)
    return jnp.broadcast_to(y[:, :, None, None], (n, c_out, h, w))


if __name__ == "__main__":
    root = jax.random.PRNGKey(0)
    key_a, key_b = jax.random.split(root)

    def make_inputs(key, n, c_in, c_out, h, w):
        k1, k2, k3, k4, k5, k6 = jax.random.split(key, 6)
        x = jax.random.normal(k1, (n, c_in, h, w), dtype=jnp.float32)
        conv_w = jax.random.normal(k2, (c_out, c_in, 1, 1), dtype=jnp.float32) * 0.1
        bn_gamma = jax.random.uniform(k3, (c_out,), minval=0.5, maxval=1.5)
        bn_beta = jax.random.normal(k4, (c_out,)) * 0.1
        bn_mean = jax.random.normal(k5, (c_out,)) * 0.1
        bn_var = jax.random.uniform(k6, (c_out,), minval=0.5, maxval=1.5)
        return x, conv_w, bn_gamma, bn_beta, bn_mean, bn_var

    # 1) Small baseline: single full-width HW block.
    args = make_inputs(key_a, 2, 4, 8, 16, 16)
    ref1 = reference(*args)
    out1 = jax.block_until_ready(global_avg_pooling(*args))
    assert out1.shape == (2, 8, 16, 16)
    assert jnp.allclose(out1, ref1, atol=1e-5, rtol=1e-5)

    # 2) Force multiple HW tiles (accumulator / pl.when finalize path).
    out2 = jax.block_until_ready(global_avg_pooling(*args, hw_tile=128))
    assert jnp.allclose(out2, ref1, atol=1e-5, rtol=1e-5)

    # 3) Ragged last tile (HW=324 not a multiple of 128) + N==1 channel split.
    args3 = make_inputs(key_b, 1, 32, 8, 18, 18)
    ref3 = reference(*args3)
    out3 = jax.block_until_ready(global_avg_pooling(*args3, hw_tile=128))
    assert jnp.allclose(out3, ref3, atol=1e-5, rtol=1e-5)

    # 4) Same shape, default tiling: full-width non-128-aligned block.
    out4 = jax.block_until_ready(global_avg_pooling(*args3))
    assert jnp.allclose(out4, ref3, atol=1e-5, rtol=1e-5)

    print("KERNEL_OK")
</pallas_src>

<mosaic_0001>
module attributes {stable_mosaic.version = 11 : i64} {
  func.func @_gap_reduce_kernel(%arg0: i32, %arg1: i32, %arg2: i32, %arg3: memref<1x4x256xf32, #tpu.memory_space<vmem>>, %arg4: memref<1x8x4xf32, #tpu.memory_space<vmem>>, %arg5: memref<1x8x1xf32, #tpu.memory_space<vmem>>, %arg6: memref<4x1xf32, #tpu.memory_space<vmem>>) attributes {dimension_semantics = [#tpu.dimension_semantics<parallel>, #tpu.dimension_semantics<parallel>, #tpu.dimension_semantics<arbitrary>], iteration_bounds = array<i64: 1, 2, 1>, scalar_prefetch = 0 : i64, scratch_operands = 1 : i64, tpu.core_type = #tpu.core_type<tc>, window_params = [{transform_indices = @transform_0, window_bounds = array<i64: 1, 4, 256>}, {transform_indices = @transform_1, window_bounds = array<i64: 1, 8, 4>}, {transform_indices = @transform_2, window_bounds = array<i64: 1, 8, 1>}]} {
    %c0_i32 = arith.constant 0 : i32
    %0 = arith.cmpi eq, %arg2, %c0_i32 : i32
    %1 = arith.extui %0 : i1 to i32
    %c0_i32_0 = arith.constant 0 : i32
    %2 = arith.cmpi ne, %1, %c0_i32_0 : i32
    scf.if %2 {
      %cst_9 = arith.constant 0.000000e+00 : f32
      %13 = vector.broadcast %cst_9 : f32 to vector<4x1xf32>
      %c0_10 = arith.constant 0 : index
      %c0_11 = arith.constant 0 : index
      %14 = vector.load %arg6[%c0_10, %c0_11] : memref<4x1xf32, #tpu.memory_space<vmem>>, vector<4x1xf32>
      tpu.vector_store %arg6[%c0_10, %c0_11], %13 {strides = array<i32>} : memref<4x1xf32, #tpu.memory_space<vmem>>, vector<4x1xf32>,
    } else {
    }
    %c0 = arith.constant 0 : index
    %c0_1 = arith.constant 0 : index
    %3 = vector.load %arg6[%c0, %c0_1] : memref<4x1xf32, #tpu.memory_space<vmem>>, vector<4x1xf32>
    %c0_2 = arith.constant 0 : index
    %c0_3 = arith.constant 0 : index
    %c0_4 = arith.constant 0 : index
    %4 = vector.load %arg3[%c0_2, %c0_3, %c0_4] : memref<1x4x256xf32, #tpu.memory_space<vmem>>, vector<1x4x256xf32>
    %5 = vector.shape_cast %4 : vector<1x4x256xf32> to vector<4x256xf32>
    %cst = arith.constant dense<0.000000e+00> : vector<4xf32>
    %6 = vector.multi_reduction <add>, %5, %cst [1] : vector<4x256xf32> to vector<4xf32>
    %7 = vector.shape_cast %6 : vector<4xf32> to vector<4x1xf32>
    %8 = arith.addf %3, %7 : vector<4x1xf32>
    %c0_5 = arith.constant 0 : index
    %c0_6 = arith.constant 0 : index
    %9 = vector.load %arg6[%c0_5, %c0_6] : memref<4x1xf32, #tpu.memory_space<vmem>>, vector<4x1xf32>
    tpu.vector_store %arg6[%c0_5, %c0_6], %8 {strides = array<i32>} : memref<4x1xf32, #tpu.memory_space<vmem>>, vector<4x1xf32>,
    %c0_i32_7 = arith.constant 0 : i32
    %10 = arith.cmpi eq, %arg2, %c0_i32_7 : i32
    %11 = arith.extui %10 : i1 to i32
    %c0_i32_8 = arith.constant 0 : i32
    %12 = arith.cmpi ne, %11, %c0_i32_8 : i32
    scf.if %12 {
      %c0_9 = arith.constant 0 : index
      %c0_10 = arith.constant 0 : index
      %13 = vector.load %arg6[%c0_9, %c0_10] : memref<4x1xf32, #tpu.memory_space<vmem>>, vector<4x1xf32>
      %cst_11 = arith.constant 3.906250e-03 : f32
      %14 = vector.broadcast %cst_11 : f32 to vector<4x1xf32>
      %15 = arith.mulf %13, %14 : vector<4x1xf32>
      %c0_12 = arith.constant 0 : index
      %c0_13 = arith.constant 0 : index
      %c0_14 = arith.constant 0 : index
      %16 = vector.load %arg4[%c0_12, %c0_13, %c0_14] : memref<1x8x4xf32, #tpu.memory_space<vmem>>, vector<1x8x4xf32>
      %17 = vector.shape_cast %16 : vector<1x8x4xf32> to vector<8x4xf32>
      %cst_15 = arith.constant dense<0.000000e+00> : vector<8x1xf32>
      %18 = tpu.matmul %17, %15, %cst_15 {dimension_numbers = #tpu.dot_dimension_numbers<[1], [0], [0], [1], [0, 0, 1, 1], [], []>, precision = #tpu.contract_precision<fp32>} : vector<8x4xf32>, vector<4x1xf32>, vector<8x1xf32> -> vector<8x1xf32>
      %c0_16 = arith.constant 0 : index
      %c0_17 = arith.constant 0 : index
      %c0_18 = arith.constant 0 : index
      %19 = vector.load %arg5[%c0_16, %c0_17, %c0_18] : memref<1x8x1xf32, #tpu.memory_space<vmem>>, vector<1x8x1xf32>
      %20 = vector.shape_cast %19 : vector<1x8x1xf32> to vector<8x1xf32>
      %21 = vector.shape_cast %18 : vector<8x1xf32> to vector<1x8x1xf32>
      tpu.vector_store %arg5[%c0_16, %c0_17, %c0_18], %21 {strides = array<i32>} : memref<1x8x1xf32, #tpu.memory_space<vmem>>, vector<1x8x1xf32>,
    } else {
    }
    return
  }
  func.func @transform_0(%arg0: i32, %arg1: i32, %arg2: i32) -> (i32, i32, i32) {
    %c0_i32 = arith.constant 0 : i32
    return %arg1, %arg0, %arg2 : i32, i32, i32
  }
  func.func @transform_1(%arg0: i32, %arg1: i32, %arg2: i32) -> (i32, i32, i32) {
    %c0_i32 = arith.constant 0 : i32
    %c0_i32_0 = arith.constant 0 : i32
    %c0_i32_1 = arith.constant 0 : i32
    return %arg0, %c0_i32, %c0_i32_0 : i32, i32, i32
  }
  func.func @transform_2(%arg0: i32, %arg1: i32, %arg2: i32) -> (i32, i32, i32) {
    %c2_i32 = arith.constant 2 : i32
    %0 = arith.muli %arg0, %c2_i32 : i32
    %1 = arith.addi %0, %arg1 : i32
    %c0_i32 = arith.constant 0 : i32
    %c0_i32_0 = arith.constant 0 : i32
    %c0_i32_1 = arith.constant 0 : i32
    return %1, %c0_i32, %c0_i32_0 : i32, i32, i32
  }
}

</mosaic_0001>

<bundles_post_ra>
// kernel: tpu_custom_call.1
= control target key start
LH: loop header
LB: loop body
LE: loop exit
PB: predicated region body
PF: predicated region fallthrough
CT: control target
= control target key end

     0   :  { %7 = vsyncpa [#allocation4], 0  ;;  %s767_s0 = inlined_call_operand.hbm [shape: f32[2,4,256], index: 0, kind: input, shape index: {}]   ;;  %s768_s1 = inlined_call_operand.vmem [shape: f32[1,8,4], index: 1, kind: input, shape index: {}]   ;;  %s769_s2 = inlined_call_operand.vmem [shape: f32[2,8,1], index: 2, kind: output, shape index: {}]  }
   0x1   :  { %9 = vsyncpa [#allocation4 + $0x1], 0  ;;  %s671_s9 = smov 0   ;;  %s673_s10 = smov 0  }
   0x2   :  { %s675_s11 = smov 0   ;;  %s677_s12 = smov 0  }
   0x3   :  { %s679_s13 = smov 0   ;;  %s681_s14 = smov 0  }
   0x4 LB: > { %s503_s15 = sadd.s32 4294967295, %s653_s14   ;;  %s30_s16 = sadd.s32 1, %s649_s13  ;;  %s653_s14 = sphi %s681_s14, %s15_s14   ;;  %s649_s13 = sphi %s679_s13, %s776_s13   ;;  %s645_s12 = sphi %s677_s12, %s775_s12   ;;  %s641_s11 = sphi %s675_s11, %s774_s11   ;;  %s637_s10 = sphi %s673_s10, %s773_s10   ;;  %s633_s9 = sphi %s671_s9, %s772_s9  }
   0x5   : > { %p32_p0 = scmp.ge.s32.totalorder %s30_s16, 2  ;;  %s45_s17 = sadd.s32 1, %s641_s11 }
   0x6   : > { %p52_p1 = scmp.ne.s32.totalorder %s641_s11, %s637_s10  ;;  %p53_p2 = scmp.eq.s32.totalorder %s653_s14, 0 }
   0x7   : > { %s778_s16 = smov (%p32_p0, %s30_s16), 0  ;;  %p58_p4 = scmp.ne.s32.totalorder %s637_s10, %s633_s9 }
   0x8   : > { %p707_p3 = por %p53_p2, %p52_p1  ;;  %s38_s19 = ssub.s32 %s649_s13, %s778_s16 }
   0x9   : > { %p59_p5 = scmp.eq.s32.totalorder %s503_s15, 0  ;;  %p43_p6 = scmp.eq.s32.totalorder %s38_s19, 0 }
   0xa   : > { %p523_p8 = scmp.lt.s32.totalorder %s653_s14, 2  ;;  %s145_s22 = sand.u32 1, %s641_s11  }
   0xb   : > { %p714_p7 = por %p59_p5, %p58_p4  ;;  %s516_s23 = sshll.u32 %s649_s13, 3 }
   0xc   : > { %s720_s21 = scalar_select %p43_p6, %s641_s11, %s45_s17  }
   0xd   : > { %s508_s24 = sshll.u32 %s145_s22, 3  ;;  %s158_s27 = scalar_lea.hbm %s767_s0, %s516_s23 }
   0xe   : > { %s160_s28 = sshll.u32 %s158_s27, 4  ;;  %s149_s29 = scalar_lea.vmem [#allocation3], %s508_s24  ;;  %s161_s28 = int_to_ptr.hbm [resolvable:$true] %s160_s28 }
   0xf   : > { %s162_s30 = sshll.u32 %s149_s29, 4  ;;  %p520_p9 = pnand %p523_p8, %p707_p3  ;;  %s163_s30 = int_to_ptr.vmem [resolvable:$true] %s162_s30 }
  0x10   : > { %p511_p10 = scmp.ge.s32.totalorder %s653_s14, 1  ;;  %p167_p11 = scmp.lt.s32.totalorder %s653_s14, 3 }
  0x11   : > { %s146_s3 = scalar_lea.sflag [#allocation4], %s145_s22 }
  0x12   : > { %522 = dma.hbm_to_vmem [thread:$0]  (!%p520_p9), %s161_s28, 128, %s163_s30, %s146_s3  }
  0x13   : > { %p168_p12 = pnand %p511_p10, %p167_p11 }
  0x14   : > { %s173_s4 = sand.u32 (!%p168_p12), 1, %s637_s10  }
  0x15   : > { %171 = sbr.rel (%p168_p12) target bundleno = 317 (0x13d), region = 28  ;;  %s512_s5 = sshll.u32 (!%p168_p12), %s173_s4, 3 }
  0x16   : > { %s174_s6 = scalar_lea.sflag (!%p168_p12), [#allocation4], %s173_s4  ;;  %s177_s7 = scalar_lea.vmem (!%p168_p12), [#allocation3], %s512_s5 }
  0x1a   : > { %628 = dma.done.wait (%p714_p7), %s174_s6, 128  }
  0x1b   : > { %630 = vsyncadd (%p714_p7), %s174_s6, 4294967168  ;;  %vm221_vm0 = vcmask 3072   ;;  %v655_v0 = vmov 0.0   ;;  %v224_v1 = vld [vmem:[%s177_s7] sm:$0xff]  ;;  %vm231_vm1 = vcmask 1043456   ;;  %v245_v7 = vld [vmem:[%s768_s1] sm:$0xff] }
  0x1c   : > { %222 = vst.msk [vmem:[#allocation2] sm:$0xf] %vm221_vm0, %v655_v0  ;;  %vm246_vm2 = vcmask 31744   ;;  %p211_p13 = scmp.lt.s32.totalorder %s645_s12, 1  ;;  %vm399_vm3 = vcmask 7168  }
  0x1d   : > { %226 = vst [vmem:[#allocation1] ss:$2 sm:$0xff] %v224_v1  ;;  %v248_v8 = vsel %vm246_vm2, %v245_v7, 0 }
  0x1e   : > { %v270_v9 = vand.u32 4294901760, %v248_v8  ;;  %s780_s12 = smov (!%p211_p13, %s645_s12), 1 }
  0x1f   : > { %s513_s15 = sshll.u32 %s780_s12, 3 }
  0x20   : > { %v271_v13 = vsub.f32 %v248_v8, %v270_v9  ;;  %s214_s19 = scalar_lea.vmem %s769_s2, %s513_s15 }
  0x22   : > { %v272_v14 = vand.u32 4294901760, %v271_v13 }
  0x23   : > { %v223_v10 = vld [vmem:[#allocation2] sm:$0xf] }
  0x24   : > { %v227_v2 = vld.sshfl [vmem:[#allocation1] sm:$0xff pattern:$0x75316420]  ;;  %v228_v3 = vld.sshfl [vmem:[#allocation1 + $0x8] sm:$0xff pattern:$0x75316420]  ;;  %v273_v15 = vsub.f32 %v271_v13, %v272_v14 }
  0x25   : > { %v232_v4 = vsel %vm231_vm1, %v227_v2, 0.0  ;;  %v233_v5 = vsel %vm231_vm1, %v228_v3, 0.0 }
  0x26   : > { %v234_v6 = vadd.f32 %v233_v5, %v232_v4  ;;  %v274_v19 = vand.u32 4294901760, %v273_v15 }
  0x28   : > { %235 = vadd.xlane.f32.xlu0 %v234_v6 }
  0x9b   : > { %v236_v11 = vpop.xlane.xlu0 %235 }
  0x9c   : > { %v237_v12 = vadd.f32 %v236_v11, %v223_v10 }
  0x9e   : > { %239 = vst.msk [vmem:[#allocation2] sm:$0xf] %vm221_vm0, %v237_v12 }
  0xa5   : > { %v243_v16 = vld [vmem:[#allocation2] sm:$0xf] }
  0xa6   : > { %v244_v17 = vmul.f32 0.00390625, %v243_v16 }
  0xa8   : > { %v251_v18 = vsel %vm231_vm1, %v244_v17, 0 }
  0xa9   : > { %v268_v20 = vand.u32 4294901760, %v251_v18 }
  0xab   : > { %269 = vmatpush.msra.mxu0 %v268_v20  ;;  %345 = vmatpush.msra.mxu3 %v268_v20  ;;  %v295_v21 = vsub.f32 %v251_v18, %v268_v20 }
  0xac   : > { %275 = vmatmul.f32.vlgmr.msra.gmra.mxu0 %v274_v19  ;;  %349 = vmatmul.f32.vlgmr.msra.gmra.mxu3 %v272_v14 }
  0xad   : > { %322 = vmatpush.msra.mxu2 %v295_v21  ;;  %v296_v22 = vand.u32 4294901760, %v295_v21 }
  0xae   : > { %325 = vmatmul.f32.vlgmr.msra.gmra.mxu2 %v271_v13 }
  0xaf   : > { %371 = vmatpush.msrb.mxu0 %v296_v22  ;;  %v297_v23 = vsub.f32 %v295_v21, %v296_v22 }
  0xb1   : > { %v298_v24 = vand.u32 4294901760, %v297_v23 }
  0xb3   : > { %299 = vmatpush.msra.mxu1 %v298_v24 }
  0xb4   : > { %301 = vmatmul.f32.vlgmr.msra.gmra.mxu1 %v270_v9  ;;  %373 = vmatmul.f32.vlgmr.msrb.gmra.mxu0 %v270_v9 }
  0xb5   : > { %393 = vmatpush.msrb.mxu1 %v268_v20 }
  0xbc   : > { %395 = vmatmul.f32.vlgmr.msrb.gmra.mxu1 %v270_v9 }
 0x129   : > { %v276_v25 = vpop.f32.mrf.mxu0 }
 0x12f   : > { %v350_v29 = vpop.f32.mrf.mxu3 }
 0x131   : > { %v302_v26 = vpop.f32.mrf.mxu1  ;;  %v326_v27 = vpop.f32.mrf.mxu2 }
 0x132   : > { %v303_v28 = vadd.f32 %v302_v26, %v276_v25  ;;  %v374_v31 = vpop.f32.mrf.mxu0 }
 0x134   : > { %v327_v30 = vadd.f32 %v326_v27, %v303_v28 }
 0x136   : > { %v351_v32 = vadd.f32 %v350_v29, %v327_v30 }
 0x138   : > { %v375_v33 = vadd.f32 %v374_v31, %v351_v32 }
 0x139   : > { %v396_v34 = vpop.f32.mrf.mxu1 }
 0x13a   : > { %v397_v35 = vadd.f32 %v396_v34, %v375_v33 }
 0x13c   : > { %400 = vst.msk [vmem:[%s214_s19] sm:$0xff] %vm399_vm3, %v397_v35 }
 0x13d PF: > { %s15_s14 = sadd.s32 1, %s653_s14   ;;  %s772_s9 = smov %s637_s10 }
 0x13e   : > { %p12_p0 = scmp.ge.s32.totalorder %s15_s14, 4   ;;  %s773_s10 = smov %s641_s11 }
 0x13f   : > { %s774_s11 = smov %s720_s21  ;;  %s775_s12 = smov %s649_s13 }
 0x140   : > { %s776_s13 = smov %s778_s16  ;;  %14 = sbr.rel (!%p12_p0) target bundleno = 4 (0x4), region = 79 }
 0x145   :  { %426 = vsyncpa [#allocation4], 1 }
 0x146   :  { %428 = vsyncpa [#allocation4 + $0x1], 1 }

</bundles_post_ra>
